<compile_context>
chip_gen: v7x
topology: tpu7x:2x2x1
jax: 0.10.0
libtpu: 0.0.40
codegen_flags: <defaults>
</compile_context>

<pallas_src>
import jax
import jax.numpy as jnp
from jax.experimental import pallas as pl
from jax.experimental.pallas import tpu as pltpu


def _round_up(x, m):
    return ((x + m - 1) // m) * m


def _cdiv(a, b):
    return (a + b - 1) // b


def _choose_tiling(B, tm):
    """Pick (tm_eff, Bp): batch padded to a multiple of 8, tile derived from
    the grid count so padding waste is bounded, and >=2 grid steps for large
    batches so v7x can use both TensorCores."""
    Bp8 = _round_up(max(B, 1), 8)
    if Bp8 <= 256:
        # Single grid step; launch overhead dominates here anyway.
        return Bp8, Bp8
    g = _cdiv(Bp8, tm)
    if g < 2:
        g = 2                      # v7x: give both TensorCores work (tiles stay >= 128 rows)
    tm_eff = _round_up(_cdiv(Bp8, g), 8)
    Bp = tm_eff * _cdiv(Bp8, tm_eff)
    return tm_eff, Bp


def actor_kernel(x_ref, w1_ref, w2_ref, w3_ref, b_ref, o_ref):
    """One batch tile of the fused 3-layer MLP.

    x_ref : [TM, state_dim]        f32 or bf16
    w1_ref: [state_dim, hidden]    bf16
    w2_ref: [hidden, hidden]       bf16
    w3_ref: [hidden, out_pad=128]  bf16 (zero-padded output lanes)
    b_ref : [8, >=128]             f32  (row0=b1, row1=b2, row2=b3-padded)
    o_ref : [TM, action_dim]       f32  (only real action lanes stored)
    """
    hidden = w1_ref.shape[1]
    out_pad = w3_ref.shape[1]
    action_dim = o_ref.shape[1]

    x = x_ref[...].astype(jnp.bfloat16)   # no-op if x already bf16

    # fc1 + relu  (bf16 MXU, f32 accumulate, f32 elementwise)
    h1 = jnp.dot(x, w1_ref[...], preferred_element_type=jnp.float32)
    h1 = jnp.maximum(h1 + b_ref[0:1, :hidden], 0.0)

    # fc2 + relu
    h2 = jnp.dot(h1.astype(jnp.bfloat16), w2_ref[...],
                 preferred_element_type=jnp.float32)
    h2 = jnp.maximum(h2 + b_ref[1:2, :hidden], 0.0)

    # fc3 + tanh * 2   (compute on padded lanes, store only action_dim lanes)
    o = jnp.dot(h2.astype(jnp.bfloat16), w3_ref[...],
                preferred_element_type=jnp.float32)
    o = o + b_ref[2:3, :out_pad]
    o_ref[...] = (jnp.tanh(o[:, :action_dim]) * 2.0).astype(o_ref.dtype)


def prepare_actor_params(params):
    """One-time repacking of the f32 [in, out] params for the kernel
    (bf16 weights, fc3 padded to 128 output lanes, biases packed in one tile).
    Call once; reuse the result across forward calls."""
    w1, b1 = params["w1"], params["b1"]
    w2, b2 = params["w2"], params["b2"]
    w3, b3 = params["w3"], params["b3"]
    hidden_dim = w1.shape[1]
    action_dim = w3.shape[1]

    LANE = 128
    out_pad = _round_up(action_dim, LANE)
    bpack_w = _round_up(max(hidden_dim, action_dim), LANE)

    w1b = w1.astype(jnp.bfloat16)
    w2b = w2.astype(jnp.bfloat16)
    w3b = jnp.zeros((hidden_dim, out_pad), jnp.bfloat16)
    w3b = w3b.at[:, :action_dim].set(w3.astype(jnp.bfloat16))

    bpack = jnp.zeros((8, bpack_w), jnp.float32)
    bpack = bpack.at[0, :hidden_dim].set(b1.reshape(-1))
    bpack = bpack.at[1, :hidden_dim].set(b2.reshape(-1))
    bpack = bpack.at[2, :action_dim].set(b3.reshape(-1))

    return {"w1": w1b, "w2": w2b, "w3": w3b, "bpack": bpack,
            "action_dim": int(action_dim)}


def actor_forward(x, prepped, tm=2048):
    """x: [B, state_dim] float32; prepped: output of prepare_actor_params."""
    w1b, w2b, w3b, bpack = prepped["w1"], prepped["w2"], prepped["w3"], prepped["bpack"]
    action_dim = prepped["action_dim"]

    B, state_dim = x.shape
    hidden_dim = w1b.shape[1]
    out_pad = w3b.shape[1]
    bpack_w = bpack.shape[1]

    tm_eff, Bp = _choose_tiling(B, tm)

    if Bp != B:
        # Padding copy is needed anyway -> fold the f32->bf16 cast into it
        # (halves the x input DMA). No standalone cast pass otherwise.
        xp = jnp.zeros((Bp, state_dim), jnp.bfloat16).at[:B].set(
            x.astype(jnp.bfloat16))
    else:
        xp = x  # cast happens in-kernel, no extra HBM pass

    grid = (Bp // tm_eff,)

    out = pl.pallas_call(
        actor_kernel,
        out_shape=jax.ShapeDtypeStruct((Bp, action_dim), jnp.float32),
        grid=grid,
        in_specs=[
            pl.BlockSpec((tm_eff, state_dim), lambda i: (i, 0)),      # x: tiled on M
            pl.BlockSpec((state_dim, hidden_dim), lambda i: (0, 0)),  # w1: resident
            pl.BlockSpec((hidden_dim, hidden_dim), lambda i: (0, 0)), # w2: resident
            pl.BlockSpec((hidden_dim, out_pad), lambda i: (0, 0)),    # w3: resident
            pl.BlockSpec((8, bpack_w), lambda i: (0, 0)),             # packed biases
        ],
        out_specs=pl.BlockSpec((tm_eff, action_dim), lambda i: (i, 0)),
        compiler_params=pltpu.CompilerParams(
            dimension_semantics=("parallel",)),  # v7x: shard batch over both TCs
    )(xp, w1b, w2b, w3b, bpack)

    if Bp != B:
        out = out[:B]
    return out


def init_actor_params(key, state_dim, action_dim, hidden_dim=64):
    """Deterministic init mimicking nn.Linear default (U[-1/sqrt(fan_in), ...]).
    Weights stored as [in, out] so the kernel can do x @ W directly."""
    keys = jax.random.split(key, 6)

    def linear(kw, kb, fan_in, fan_out):
        bound = 1.0 / jnp.sqrt(jnp.float32(fan_in))
        w = jax.random.uniform(kw, (fan_in, fan_out), jnp.float32, -bound, bound)
        b = jax.random.uniform(kb, (1, fan_out), jnp.float32, -bound, bound)
        return w, b

    w1, b1 = linear(keys[0], keys[1], state_dim, hidden_dim)
    w2, b2 = linear(keys[2], keys[3], hidden_dim, hidden_dim)
    w3, b3 = linear(keys[4], keys[5], hidden_dim, action_dim)
    return {"w1": w1, "b1": b1, "w2": w2, "b2": b2, "w3": w3, "b3": b3}


def actor_reference(x, params):
    """Pure-JAX reference with matching bf16-matmul / f32-accumulate arithmetic."""
    def mm(a, w):
        return jnp.dot(a.astype(jnp.bfloat16), w.astype(jnp.bfloat16),
                       preferred_element_type=jnp.float32)
    h = jnp.maximum(mm(x, params["w1"]) + params["b1"], 0.0)
    h = jnp.maximum(mm(h, params["w2"]) + params["b2"], 0.0)
    return jnp.tanh(mm(h, params["w3"]) + params["b3"]) * 2.0


if __name__ == "__main__":
    key = jax.random.PRNGKey(0)
    k_x, k_x2, k_p = jax.random.split(key, 3)

    batch, state_dim, action_dim, hidden_dim = 2, 8, 4, 64
    params = init_actor_params(k_p, state_dim, action_dim, hidden_dim)
    prepped = prepare_actor_params(params)

    # Small batch (single grid step).
    x = jax.random.normal(k_x, (batch, state_dim), jnp.float32)
    out = jax.block_until_ready(actor_forward(x, prepped))
    ref = actor_reference(x, params)
    assert out.shape == (batch, action_dim)
    assert jnp.allclose(out, ref, atol=2e-3, rtol=2e-3), "mismatch vs reference (B=2)"

    # Larger batch exercising the multi-step grid + tile-selection path.
    x2 = jax.random.normal(k_x2, (300, state_dim), jnp.float32)
    out2 = jax.block_until_ready(actor_forward(x2, prepped))
    ref2 = actor_reference(x2, params)
    assert out2.shape == (300, action_dim)
    assert jnp.allclose(out2, ref2, atol=2e-3, rtol=2e-3), "mismatch vs reference (B=300)"

    print("KERNEL_OK")
</pallas_src>

<mosaic_0001>
module attributes {stable_mosaic.version = 11 : i64} {
  func.func @actor_kernel(%arg0: i32, %arg1: memref<8x8xbf16, #tpu.memory_space<vmem>>, %arg2: memref<8x64xbf16, #tpu.memory_space<vmem>>, %arg3: memref<64x64xbf16, #tpu.memory_space<vmem>>, %arg4: memref<64x128xbf16, #tpu.memory_space<vmem>>, %arg5: memref<8x128xf32, #tpu.memory_space<vmem>>, %arg6: memref<8x4xf32, #tpu.memory_space<vmem>>) attributes {dimension_semantics = [#tpu.dimension_semantics<parallel>], iteration_bounds = array<i64: 1>, scalar_prefetch = 0 : i64, scratch_operands = 0 : i64, tpu.core_type = #tpu.core_type<tc>, window_params = [{transform_indices = @transform_0, window_bounds = array<i64: 8, 8>}, {pipeline_mode = #tpu.pipeline_mode<synchronous>, transform_indices = @transform_1, window_bounds = array<i64: 8, 64>}, {pipeline_mode = #tpu.pipeline_mode<synchronous>, transform_indices = @transform_2, window_bounds = array<i64: 64, 64>}, {pipeline_mode = #tpu.pipeline_mode<synchronous>, transform_indices = @transform_3, window_bounds = array<i64: 64, 128>}, {pipeline_mode = #tpu.pipeline_mode<synchronous>, transform_indices = @transform_4, window_bounds = array<i64: 8, 128>}, {transform_indices = @transform_5, window_bounds = array<i64: 8, 4>}]} {
    %c0 = arith.constant 0 : index
    %c0_0 = arith.constant 0 : index
    %0 = vector.load %arg1[%c0, %c0_0] : memref<8x8xbf16, #tpu.memory_space<vmem>>, vector<8x8xbf16>
    %c0_1 = arith.constant 0 : index
    %c0_2 = arith.constant 0 : index
    %1 = vector.load %arg2[%c0_1, %c0_2] : memref<8x64xbf16, #tpu.memory_space<vmem>>, vector<8x64xbf16>
    %cst = arith.constant dense<0.000000e+00> : vector<8x64xf32>
    %2 = tpu.matmul %0, %1, %cst {dimension_numbers = #tpu.dot_dimension_numbers<[1], [0], [0], [1], [0, 0, 1, 1], [], []>} : vector<8x8xbf16>, vector<8x64xbf16>, vector<8x64xf32> -> vector<8x64xf32>
    %c0_3 = arith.constant 0 : index
    %c0_4 = arith.constant 0 : index
    %3 = vector.load %arg5[%c0_3, %c0_4] : memref<8x128xf32, #tpu.memory_space<vmem>>, vector<1x64xf32>
    %4 = vector.broadcast %3 : vector<1x64xf32> to vector<8x64xf32>
    %5 = arith.addf %2, %4 : vector<8x64xf32>
    %cst_5 = arith.constant 0.000000e+00 : f32
    %6 = vector.broadcast %cst_5 : f32 to vector<8x64xf32>
    %7 = arith.maximumf %5, %6 : vector<8x64xf32>
    %8 = arith.truncf %7 : vector<8x64xf32> to vector<8x64xbf16>
    %c0_6 = arith.constant 0 : index
    %c0_7 = arith.constant 0 : index
    %9 = vector.load %arg3[%c0_6, %c0_7] : memref<64x64xbf16, #tpu.memory_space<vmem>>, vector<64x64xbf16>
    %cst_8 = arith.constant dense<0.000000e+00> : vector<8x64xf32>
    %10 = tpu.matmul %8, %9, %cst_8 {dimension_numbers = #tpu.dot_dimension_numbers<[1], [0], [0], [1], [0, 0, 1, 1], [], []>} : vector<8x64xbf16>, vector<64x64xbf16>, vector<8x64xf32> -> vector<8x64xf32>
    %c1 = arith.constant 1 : index
    %c0_9 = arith.constant 0 : index
    %11 = vector.load %arg5[%c1, %c0_9] : memref<8x128xf32, #tpu.memory_space<vmem>>, vector<1x64xf32>
    %12 = vector.broadcast %11 : vector<1x64xf32> to vector<8x64xf32>
    %13 = arith.addf %10, %12 : vector<8x64xf32>
    %cst_10 = arith.constant 0.000000e+00 : f32
    %14 = vector.broadcast %cst_10 : f32 to vector<8x64xf32>
    %15 = arith.maximumf %13, %14 : vector<8x64xf32>
    %16 = arith.truncf %15 : vector<8x64xf32> to vector<8x64xbf16>
    %c0_11 = arith.constant 0 : index
    %c0_12 = arith.constant 0 : index
    %17 = vector.load %arg4[%c0_11, %c0_12] : memref<64x128xbf16, #tpu.memory_space<vmem>>, vector<64x128xbf16>
    %cst_13 = arith.constant dense<0.000000e+00> : vector<8x128xf32>
    %18 = tpu.matmul %16, %17, %cst_13 {dimension_numbers = #tpu.dot_dimension_numbers<[1], [0], [0], [1], [0, 0, 1, 1], [], []>} : vector<8x64xbf16>, vector<64x128xbf16>, vector<8x128xf32> -> vector<8x128xf32>
    %c2 = arith.constant 2 : index
    %c0_14 = arith.constant 0 : index
    %19 = vector.load %arg5[%c2, %c0_14] : memref<8x128xf32, #tpu.memory_space<vmem>>, vector<1x128xf32>
    %20 = vector.broadcast %19 : vector<1x128xf32> to vector<8x128xf32>
    %21 = arith.addf %18, %20 : vector<8x128xf32>
    %22 = vector.extract_strided_slice %21 {offsets = [0, 0], sizes = [8, 4], strides = [1, 1]} : vector<8x128xf32> to vector<8x4xf32>
    %23 = math.tanh %22 : vector<8x4xf32>
    %cst_15 = arith.constant 2.000000e+00 : f32
    %24 = vector.broadcast %cst_15 : f32 to vector<8x4xf32>
    %25 = arith.mulf %23, %24 : vector<8x4xf32>
    %c0_16 = arith.constant 0 : index
    %c0_17 = arith.constant 0 : index
    %26 = vector.load %arg6[%c0_16, %c0_17] : memref<8x4xf32, #tpu.memory_space<vmem>>, vector<8x4xf32>
    tpu.vector_store %arg6[%c0_16, %c0_17], %25 {strides = array<i32>} : memref<8x4xf32, #tpu.memory_space<vmem>>, vector<8x4xf32>,
    return
  }
  func.func @transform_0(%arg0: i32) -> (i32, i32) {
    %c0_i32 = arith.constant 0 : i32
    %c0_i32_0 = arith.constant 0 : i32
    return %arg0, %c0_i32 : i32, i32
  }
  func.func @transform_1(%arg0: i32) -> (i32, i32) {
    %c0_i32 = arith.constant 0 : i32
    %c0_i32_0 = arith.constant 0 : i32
    %c0_i32_1 = arith.constant 0 : i32
    return %c0_i32, %c0_i32_0 : i32, i32
  }
  func.func @transform_2(%arg0: i32) -> (i32, i32) {
    %c0_i32 = arith.constant 0 : i32
    %c0_i32_0 = arith.constant 0 : i32
    %c0_i32_1 = arith.constant 0 : i32
    return %c0_i32, %c0_i32_0 : i32, i32
  }
  func.func @transform_3(%arg0: i32) -> (i32, i32) {
    %c0_i32 = arith.constant 0 : i32
    %c0_i32_0 = arith.constant 0 : i32
    %c0_i32_1 = arith.constant 0 : i32
    return %c0_i32, %c0_i32_0 : i32, i32
  }
  func.func @transform_4(%arg0: i32) -> (i32, i32) {
    %c0_i32 = arith.constant 0 : i32
    %c0_i32_0 = arith.constant 0 : i32
    %c0_i32_1 = arith.constant 0 : i32
    return %c0_i32, %c0_i32_0 : i32, i32
  }
  func.func @transform_5(%arg0: i32) -> (i32, i32) {
    %c0_i32 = arith.constant 0 : i32
    %c0_i32_0 = arith.constant 0 : i32
    return %arg0, %c0_i32 : i32, i32
  }
}

</mosaic_0001>

<bundles_post_ra>
// kernel: tpu_custom_call.1
= control target key start
LH: loop header
LB: loop body
LE: loop exit
PB: predicated region body
PF: predicated region fallthrough
CT: control target
= control target key end

     0   :  { %10 = vsyncpa [#allocation3], 0  ;;  %s574_s0 = inlined_call_operand.hbm [shape: bf16[8,8], index: 0, kind: input, shape index: {}]   ;;  %s575_s1 = inlined_call_operand.hbm [shape: bf16[8,64], index: 1, kind: input, shape index: {}]   ;;  %s576_s2 = inlined_call_operand.hbm [shape: bf16[64,64], index: 2, kind: input, shape index: {}]   ;;  %s577_s3 = inlined_call_operand.hbm [shape: bf16[64,128], index: 3, kind: input, shape index: {}]   ;;  %s578_s4 = inlined_call_operand.vmem [shape: f32[8,128], index: 4, kind: input, shape index: {}]   ;;  %s579_s5 = inlined_call_operand.vmem [shape: f32[8,4], index: 5, kind: output, shape index: {}]  }
   0x1   :  { %11 = vsyncpa [#allocation5], 0 }
   0x2   :  { %12 = vsyncpa [#allocation8], 0  ;;  %s471_s18 = smov [#allocation4]   ;;  %s472_s20 = smov [#allocation2]  }
   0x3   :  { %s29_s19 = sshll.u32 %s471_s18, 4  ;;  %s19_s21 = sshll.u32 %s472_s20, 4  ;;  %s30_s19 = int_to_ptr.vmem [resolvable:$true] %s29_s19  ;;  %s20_s21 = int_to_ptr.vmem [resolvable:$true] %s19_s21 }
   0x4   :  { %s377_s24 = scalar_lea.hbm %s575_s1, 64 }
   0x5   :  { %p378_p0 = scmp.ne.s32.totalorder %s575_s1, %s377_s24  ;;  %p381_p1 = scmp.lt.u32.totalorder %s377_s24, %s575_s1 }
   0x7   :  { %p383_p2 = pnand %p381_p1, %p378_p0 }
   0x9   :  { %386 = shalt.err (!%p383_p2)
}
   0xa   :  { %s387_s29 = scalar_lea.vmem %s30_s19, 64  ;;  %p392_p4 = scmp.lt.s32.totalorder %s30_s19, %s30_s19 }
   0xb   :  { %p388_p3 = scmp.ne.s32.totalorder %s30_s19, %s387_s29  ;;  %p393_p5 = scmp.lt.s32.totalorder %s387_s29, %s387_s29 }
   0xd   :  { %p394_p6 = por %p393_p5, %p392_p4 }
   0xf   :  { %p395_p7 = pnand %p394_p6, %p388_p3 }
  0x11   :  { %398 = shalt.err (!%p395_p7)
}
  0x12   :  { %32 = dma.hbm_to_vmem [thread:$0]  %s575_s1, 64, %s30_s19, [#allocation5]  }
  0x13   :  { %s399_s9 = scalar_lea.hbm %s574_s0, 64 }
  0x14   :  { %p400_p8 = scmp.ne.s32.totalorder %s574_s0, %s399_s9  ;;  %p403_p9 = scmp.lt.u32.totalorder %s399_s9, %s574_s0 }
  0x16   :  { %p405_p10 = pnand %p403_p9, %p400_p8 }
  0x18   :  { %408 = shalt.err (!%p405_p10)
}
  0x19   :  { %s409_s14 = scalar_lea.vmem %s20_s21, 64  ;;  %p414_p12 = scmp.lt.s32.totalorder %s20_s21, %s20_s21 }
  0x1a   :  { %p410_p11 = scmp.ne.s32.totalorder %s20_s21, %s409_s14  ;;  %p415_p13 = scmp.lt.s32.totalorder %s409_s14, %s409_s14 }
  0x1c   :  { %p416_p0 = por %p415_p13, %p414_p12 }
  0x1e   :  { %p417_p1 = pnand %p416_p0, %p410_p11 }
  0x20   :  { %420 = shalt.err (!%p417_p1)
}
  0x21   :  { %22 = dma.hbm_to_vmem [thread:$0]  %s574_s0, 64, %s20_s21, [#allocation3]  }
  0x22   :  { %s473_s16 = smov [#allocation6]   ;;  %s421_s20 = scalar_lea.hbm %s576_s2, 512 }
  0x23   :  { %s38_s17 = sshll.u32 %s473_s16, 4  ;;  %p422_p2 = scmp.ne.s32.totalorder %s576_s2, %s421_s20  ;;  %s39_s17 = int_to_ptr.vmem [resolvable:$true] %s38_s17 }
  0x24   :  { %p425_p3 = scmp.lt.u32.totalorder %s421_s20, %s576_s2 }
  0x26   :  { %p427_p4 = pnand %p425_p3, %p422_p2 }
  0x28   :  { %430 = shalt.err (!%p427_p4)
}
  0x29   :  { %s431_s26 = scalar_lea.vmem %s39_s17, 512  ;;  %p436_p6 = scmp.lt.s32.totalorder %s39_s17, %s39_s17 }
  0x2a   :  { %p432_p5 = scmp.ne.s32.totalorder %s39_s17, %s431_s26  ;;  %p437_p7 = scmp.lt.s32.totalorder %s431_s26, %s431_s26 }
  0x2c   :  { %p438_p8 = por %p437_p7, %p436_p6 }
  0x2e   :  { %p439_p9 = pnand %p438_p8, %p432_p5 }
  0x30   :  { %442 = shalt.err (!%p439_p9)
}
  0x31   :  { %s474_s0 = smov 64   ;;  %s475_s21 = smov 4  }
  0x32   :  { %44 = dma.hbm_to_vmem [thread:$0]  %s576_s2, 512, %s39_s17, [#allocation5], %s474_s0, %s474_s0, %s475_s21  }
  0x33   :  { %s476_s29 = smov [#allocation7]   ;;  %s443_s8 = scalar_lea.hbm %s577_s3, 512 }
  0x34   :  { %s50_s30 = sshll.u32 %s476_s29, 4  ;;  %p444_p10 = scmp.ne.s32.totalorder %s577_s3, %s443_s8  ;;  %s51_s30 = int_to_ptr.vmem [resolvable:$true] %s50_s30 }
  0x35   :  { %p447_p11 = scmp.lt.u32.totalorder %s443_s8, %s577_s3 }
  0x37   :  { %p449_p12 = pnand %p447_p11, %p444_p10 }
  0x39   :  { %452 = shalt.err (!%p449_p12)
}
  0x3a   :  { %s453_s13 = scalar_lea.vmem %s51_s30, 512  ;;  %p458_p0 = scmp.lt.s32.totalorder %s51_s30, %s51_s30 }
  0x3b   :  { %p454_p13 = scmp.ne.s32.totalorder %s51_s30, %s453_s13  ;;  %p459_p1 = scmp.lt.s32.totalorder %s453_s13, %s453_s13 }
  0x3d   :  { %p460_p2 = por %p459_p1, %p458_p0 }
  0x3f   :  { %p461_p3 = pnand %p460_p2, %p454_p13 }
  0x41   :  { %464 = shalt.err (!%p461_p3)
}
  0x42   :  { %56 = dma.hbm_to_vmem [thread:$0]  %s577_s3, 512, %s51_s30, [#allocation8], %s474_s0, %s474_s0, %s475_s21  }
  0x43   :  { %465 = dma.done.wait [#allocation3], 64  }
  0x44   :  { %466 = vsyncadd [#allocation3], 4294967232 }
  0x45   :  { %467 = dma.done.wait [#allocation5], 576  }
  0x46   :  { %468 = vsyncadd [#allocation5], 4294966720 }
  0x47   :  { %469 = dma.done.wait [#allocation8], 512  }
  0x48   :  { %470 = vsyncadd [#allocation8], 4294966784  ;;  %v477_v0 = vmov 0.0   ;;  %vm478_vm0 = vmmov 0   ;;  %vm83_vm1 = vcmask 1043456   ;;  %v367_v3 = vld [vmem:[#allocation6] sm:$0xff]  }
  0x49   :  { %329 = vmatprep.subr.bf16.mxu0 %v477_v0  ;;  %331 = vmatprep.mubr.msk.bf16.mxu0 %vm478_vm0, %v477_v0  ;;  %v73_v1 = vld [vmem:[#allocation4] sm:$0xf]  ;;  %v72_v4 = vld [vmem:[#allocation2] sm:$0xf]  ;;  %vm79_vm2 = vcmask 64512   ;;  %v368_v5 = vld [vmem:[#allocation6 + $0x8] sm:$0xff]  }
  0x4a   :  { %335 = vmatprep.subr.bf16.mxu1 %v477_v0  ;;  %343 = vmatprep.mubr.msk.bf16.mxu1 %vm478_vm0, %v477_v0  ;;  %v85_v2 = vsel %vm83_vm1, %v73_v1, 0  ;;  %v369_v6 = vld [vmem:[#allocation6 + $0x10] sm:$0xff]   ;;  %v370_v7 = vld [vmem:[#allocation6 + $0x18] sm:$0xff]   ;;  %v371_v8 = vld [vmem:[#allocation7] sm:$0xff]   ;;  %vm166_vm3 = vcmask 523264   ;;  %vm294_vm4 = vcmask 31744  }
  0x4b   :  { %330 = vmatpush3.bf16.msra.mxu0 %v85_v2  ;;  %336 = vmatpush3.bf16.msra.mxu1 %v367_v3  ;;  %v372_v9 = vld [vmem:[#allocation7 + $0x8] sm:$0xff]   ;;  %v303_v10 = vld [vmem:[%s578_s4] ss:$0 sm:$0xff]  ;;  %v374_v19 = vld [vmem:[#allocation7 + $0x18] sm:$0xff]  }
  0x4c   :  { %347 = vmatprep.subr.bf16.mxu0 %v477_v0  ;;  %337 = vmatprep.subr.bf16.mxu1 %v477_v0  ;;  %v373_v18 = vld [vmem:[#allocation7 + $0x10] sm:$0xff]  }
  0x4d   :  { %v305_v20 = vld [vmem:[%s578_s4 + $0x1] ss:$0 sm:$0xff]  ;;  %v311_v28 = vld [vmem:[%s578_s4 + $0x2] ss:$0 sm:$0xff] }
  0x4e   :  { %332 = vmatmul.mubr.msk.bf16.vlgmr.msra.gmra.mrb[0].mxu0 %vm79_vm2, %v72_v4 }
  0x4f   :  { %355 = vmatprep.mubr.msk.bf16.mxu0 %vm478_vm0, %v477_v0  ;;  %338 = vmatpush3.bf16.msra.mxu1 %v368_v5 }
  0x50   :  { %339 = vmatprep.subr.bf16.mxu1 %v477_v0  ;;  %348 = vmatpush3.bf16.msra.mxu0 %v371_v8 }
  0x51   :  { %349 = vmatprep.subr.bf16.mxu0 %v477_v0 }
  0x53   :  { %340 = vmatpush3.bf16.msra.mxu1 %v369_v6 }
  0x54   :  { %341 = vmatprep.subr.bf16.mxu1 %v477_v0  ;;  %350 = vmatpush3.bf16.msra.mxu0 %v372_v9 }
  0x55   :  { %351 = vmatprep.subr.bf16.mxu0 %v477_v0 }
  0x57   :  { %342 = vmatpush3.bf16.msra.mxu1 %v370_v7 }
  0x58   :  { %352 = vmatpush3.bf16.msra.mxu0 %v373_v18 }
  0x59   :  { %353 = vmatprep.subr.bf16.mxu0 %v477_v0 }
  0x5c   :  { %354 = vmatpush3.bf16.msra.mxu0 %v374_v19 }
 0x121   :  { %v121_v11 = vpop.f32.mrb[0].mxu0 }
 0x122   :  { %v122_v12 = vadd.f32 %v303_v10, %v121_v11  ;;  %v333_v13 = vpop.f32.mrb[1].mxu0 }
 0x123   :  { %v124_v14 = vpop.f32.mrb[2].mxu0 }
 0x124   :  { %v127_v15 = vmax.f32 %v122_v12, 0.0  ;;  %v334_v16 = vpop.f32.mrb[3].mxu0 }
 0x126   :  { %v128_v17 = vpack.c.bf16 %v127_v15, %v127_v15 }
 0x128   :  { %344 = vmatmul.mubr.msk.bf16.vlgmr.msra.gmra.mrb[0].mxu1 %vm166_vm3, %v128_v17 }
 0x1fb   :  { %v204_v21 = vpop.f32.mrb[0].mxu1 }
 0x1fc   :  { %v205_v22 = vadd.f32 %v305_v20, %v204_v21  ;;  %v345_v23 = vpop.f32.mrb[1].mxu1 }
 0x1fd   :  { %v207_v24 = vpop.f32.mrb[2].mxu1 }
 0x1fe   :  { %v210_v25 = vmax.f32 %v205_v22, 0.0  ;;  %v346_v26 = vpop.f32.mrb[3].mxu1 }
 0x200   :  { %v211_v27 = vpack.c.bf16 %v210_v25, %v210_v25 }
 0x202   :  { %356 = vmatmul.mubr.msk.bf16.vlgmr.msra.gmra.mrb[4].mxu0 %vm166_vm3, %v211_v27 }
 0x2d5   :  { %v286_v29 = vpop.f32.mrb[4].mxu0 }
 0x2d6   :  { %v287_v30 = vadd.f32 %v311_v28, %v286_v29  ;;  %v357_v31 = vpop.f32.mrb[5].mxu0 }
 0x2d7   :  { %v289_v32 = vpop.f32.mrb[6].mxu0 }
 0x2d8   :  { %375 = vtanh.f32 %v287_v30  ;;  %v358_v33 = vpop.f32.mrb[7].mxu0 }
 0x2e2   :  { %v376_v34 = vpop.eup %375 }
 0x2e3   :  { %v293_v35 = vmul.f32 2.0, %v376_v34 }
 0x2e5   :  { %295 = vst.msk [vmem:[%s579_s5] sm:$0xff] %vm294_vm4, %v293_v35 }
 0x2e6   :  { %300 = vsyncpa [#allocation3], 1 }
 0x2e7   :  { %301 = vsyncpa [#allocation5], 1 }
 0x2e8   :  { %302 = vsyncpa [#allocation8], 1 }

</bundles_post_ra>
